<compile_context>
chip_gen: v6e
topology: v6e:2x2x1
jax: 0.10.0
libtpu: 0.0.40
codegen_flags: <defaults>
</compile_context>

<pallas_src>
import functools

import jax
import jax.numpy as jnp
from jax.experimental import pallas as pl
from jax.experimental.pallas import tpu as pltpu


def _concat_slice_kernel(*refs, size):
    """refs = (*input_refs, out_ref). Writes cat(inputs, cat(inputs)[:, :size])."""
    in_refs = refs[:-1]
    o_ref = refs[-1]

    widths = [r.shape[1] for r in in_refs]
    c_total = sum(widths)

    off = 0  # static Python offset into the concatenation
    for r, w in zip(in_refs, widths):
        t = r[...]
        # v1 segment: this input's column range of the concatenation.
        o_ref[:, off:off + w] = t
        # v3 contribution: if this segment overlaps the first `size` columns
        # of v1, copy that prefix into the tail of the output as well.
        if off < size:
            take = min(size - off, w)
            o_ref[:, c_total + off:c_total + off + take] = t[:, :take]
        off += w


def _row_tile(batch, bytes_per_row, dtype):
    """Pick a row tile: fits VMEM budget, respects sublane packing, <= batch."""
    itemsize = jnp.dtype(dtype).itemsize
    # Rows per packed sublane group: 8 for 32-bit, 16 for bf16, 32 for int8.
    pack = 8 * max(1, 4 // itemsize)
    # ~8 MiB per pipeline stage; x2 double-buffering ~= 16 MiB, comfortably
    # under the 32 MiB default scoped VMEM limit (v7x has 64 MiB physical).
    budget = 8 * 1024 * 1024
    tb = (budget // max(1, bytes_per_row)) // pack * pack
    tb = max(pack, tb)
    if tb >= batch:
        return batch  # full-array block: always a legal block shape
    return tb


def model_forward(*xs, size, row_tile=None):
    """JAX wrapper reproducing Model.forward(*x1) with static `size`."""
    assert len(xs) >= 1
    B = xs[0].shape[0]
    dtype = xs[0].dtype
    for x in xs:
        assert x.ndim == 2 and x.shape[0] == B and x.dtype == dtype

    widths = [x.shape[1] for x in xs]
    c_total = sum(widths)
    # PyTorch slicing v1[:, 0:size] clamps; mirror that instead of asserting.
    size_eff = max(0, min(int(size), c_total))
    out_cols = c_total + size_eff

    itemsize = jnp.dtype(dtype).itemsize
    bytes_per_row = (c_total + out_cols) * itemsize
    tb = row_tile if row_tile is not None else _row_tile(B, bytes_per_row, dtype)
    tb = min(tb, B)
    grid = (pl.cdiv(B, tb),)

    kernel = functools.partial(_concat_slice_kernel, size=size_eff)

    return pl.pallas_call(
        kernel,
        out_shape=jax.ShapeDtypeStruct((B, out_cols), dtype),
        grid=grid,
        in_specs=[pl.BlockSpec((tb, w), lambda i: (i, 0)) for w in widths],
        out_specs=pl.BlockSpec((tb, out_cols), lambda i: (i, 0)),
        compiler_params=pltpu.CompilerParams(
            dimension_semantics=("parallel",),
        ),
    )(*xs)


if __name__ == "__main__":
    SIZE = 128  # the free global `size`; 128 keeps the tail write lane-dense

    key = jax.random.PRNGKey(0)
    k0, k1 = jax.random.split(key)
    # Two variadic inputs, small but lane/sublane-friendly shapes.
    x_a = jax.random.normal(k0, (64, 128), dtype=jnp.float32)
    x_b = jax.random.normal(k1, (64, 128), dtype=jnp.float32)

    # Small row tile to exercise the pipelined grid even at demo sizes.
    out = model_forward(x_a, x_b, size=SIZE, row_tile=16)
    out = jax.block_until_ready(out)

    # Pure-JAX reference for the PyTorch semantics.
    v1 = jnp.concatenate([x_a, x_b], axis=1)
    v3 = v1[:, :SIZE]
    ref = jnp.concatenate([v1, v3], axis=1)

    assert out.shape == ref.shape, (out.shape, ref.shape)
    assert jnp.allclose(out, ref), "Pallas kernel mismatch vs reference"

    print("KERNEL_OK")
</pallas_src>

<mosaic_0001>
module attributes {stable_mosaic.version = 11 : i64} {
  func.func @_concat_slice_kernel(%arg0: i32, %arg1: memref<16x128xf32, #tpu.memory_space<vmem>>, %arg2: memref<16x128xf32, #tpu.memory_space<vmem>>, %arg3: memref<16x384xf32, #tpu.memory_space<vmem>>) attributes {dimension_semantics = [#tpu.dimension_semantics<parallel>], iteration_bounds = array<i64: 4>, scalar_prefetch = 0 : i64, scratch_operands = 0 : i64, tpu.core_type = #tpu.core_type<tc>, window_params = [{transform_indices = @transform_0, window_bounds = array<i64: 16, 128>}, {transform_indices = @transform_1, window_bounds = array<i64: 16, 128>}, {transform_indices = @transform_2, window_bounds = array<i64: 16, 384>}]} {
    %c0 = arith.constant 0 : index
    %c0_0 = arith.constant 0 : index
    %0 = vector.load %arg1[%c0, %c0_0] : memref<16x128xf32, #tpu.memory_space<vmem>>, vector<16x128xf32>
    %c0_1 = arith.constant 0 : index
    %c0_2 = arith.constant 0 : index
    %1 = vector.load %arg3[%c0_1, %c0_2] : memref<16x384xf32, #tpu.memory_space<vmem>>, vector<16x128xf32>
    tpu.vector_store %arg3[%c0_1, %c0_2], %0 {strides = array<i32>} : memref<16x384xf32, #tpu.memory_space<vmem>>, vector<16x128xf32>,
    %c0_3 = arith.constant 0 : index
    %c256 = arith.constant 256 : index
    %2 = vector.load %arg3[%c0_3, %c256] : memref<16x384xf32, #tpu.memory_space<vmem>>, vector<16x128xf32>
    tpu.vector_store %arg3[%c0_3, %c256], %0 {strides = array<i32>} : memref<16x384xf32, #tpu.memory_space<vmem>>, vector<16x128xf32>,
    %c0_4 = arith.constant 0 : index
    %c0_5 = arith.constant 0 : index
    %3 = vector.load %arg2[%c0_4, %c0_5] : memref<16x128xf32, #tpu.memory_space<vmem>>, vector<16x128xf32>
    %c0_6 = arith.constant 0 : index
    %c128 = arith.constant 128 : index
    %4 = vector.load %arg3[%c0_6, %c128] : memref<16x384xf32, #tpu.memory_space<vmem>>, vector<16x128xf32>
    tpu.vector_store %arg3[%c0_6, %c128], %3 {strides = array<i32>} : memref<16x384xf32, #tpu.memory_space<vmem>>, vector<16x128xf32>,
    return
  }
  func.func @transform_0(%arg0: i32) -> (i32, i32) {
    %c0_i32 = arith.constant 0 : i32
    %c0_i32_0 = arith.constant 0 : i32
    return %arg0, %c0_i32 : i32, i32
  }
  func.func @transform_1(%arg0: i32) -> (i32, i32) {
    %c0_i32 = arith.constant 0 : i32
    %c0_i32_0 = arith.constant 0 : i32
    return %arg0, %c0_i32 : i32, i32
  }
  func.func @transform_2(%arg0: i32) -> (i32, i32) {
    %c0_i32 = arith.constant 0 : i32
    %c0_i32_0 = arith.constant 0 : i32
    return %arg0, %c0_i32 : i32, i32
  }
}

</mosaic_0001>

<bundles_post_ra>
// kernel: tpu_custom_call.1
= control target key start
LH: loop header
LB: loop body
LE: loop exit
PB: predicated region body
PF: predicated region fallthrough
CT: control target
= control target key end

     0   :  { %7 = vsyncpa [#allocation3], 0  ;;  %s767_s0 = inlined_call_operand.hbm [shape: f32[64,128], index: 0, kind: input, shape index: {}]   ;;  %s768_s1 = inlined_call_operand.hbm [shape: f32[64,128], index: 1, kind: input, shape index: {}]   ;;  %s769_s2 = inlined_call_operand.hbm [shape: f32[64,384], index: 2, kind: output, shape index: {}]  }
   0x1   :  { %9 = vsyncpa [#allocation3 + $0x1], 0 }
   0x2   :  { %10 = vsyncpa [#allocation6], 0 }
   0x3   :  { %12 = vsyncpa [#allocation6 + $0x1], 0 }
   0x4   :  { %13 = vsyncpa [#allocation4], 0 }
   0x5   :  { %15 = vsyncpa [#allocation4 + $0x1], 0  ;;  %s550_s9 = smov 0   ;;  %s552_s10 = smov 0  }
   0x6   :  { %s554_s11 = smov 0   ;;  %s556_s12 = smov 0  }
   0x7 LB: > { %s571_s13 = sadd.s32 4294967295, %s526_s12   ;;  %s326_s14 = sadd.s32 4294967294, %s526_s12   ;;  %s526_s12 = sphi %s556_s12, %s784_s12   ;;  %s522_s11 = sphi %s554_s11, %s783_s11   ;;  %s518_s10 = sphi %s552_s10, %s782_s10   ;;  %s514_s9 = sphi %s550_s9, %s781_s9  }
   0x8   : > { %s575_s15 = sadd.s32 1, %s526_s12   ;;  %s28_s16 = sadd.s32 1, %s522_s11 }
   0x9   : > { %s25_s17 = ssub.s32 %s526_s12, %s575_s15  ;;  %p35_p0 = scmp.ne.s32.totalorder %s522_s11, %s518_s10 }
   0xa   : > { %p26_p1 = scmp.eq.s32.totalorder %s25_s17, 0  ;;  %p36_p2 = scmp.eq.s32.totalorder %s526_s12, 0 }
   0xb   : > { %p41_p3 = scmp.ne.s32.totalorder %s518_s10, %s514_s9  ;;  %p42_p4 = scmp.eq.s32.totalorder %s571_s13, 0 }
   0xc   : > { %s587_s18 = scalar_select %p26_p1, %s522_s11, %s28_s16  }
   0xd   : > { %p589_p5 = por %p36_p2, %p35_p0  ;;  %p593_p6 = por %p42_p4, %p41_p3 }
   0xe   : > { %p91_p7 = scmp.eq.s32.totalorder %s571_s13, 3  ;;  %p97_p8 = scmp.eq.s32.totalorder %s326_s14, 3 }
   0xf   : > { %s773_s20 = scalar_select %p593_p6, 1, 0 }
  0x10   : > { %p364_p9 = scmp.lt.s32.totalorder %s526_s12, 4  ;;  %p599_p10 = por %p91_p7, %p35_p0 }
  0x11   : > { %p603_p11 = por %p97_p8, %p41_p3  ;;  %s608_s23 = sand.u32 1, %s522_s11  }
  0x12   : > { %s774_s21 = scalar_select %p599_p10, 1, 0 }
  0x13   : > { %s775_s22 = scalar_select %p603_p11, 1, 0 }
  0x14   : > { %s343_s24 = sshll.u32 %s526_s12, 8  ;;  %s329_s25 = sshll.u32 %s608_s23, 4 }
  0x15   : > { %s617_s28 = scalar_lea.hbm %s767_s0, %s343_s24  ;;  %s121_s29 = scalar_lea.vmem [#allocation2], %s329_s25 }
  0x16   : > { %s128_s30 = sshll.u32 %s121_s29, 4  ;;  %p623_p12 = pnand %p364_p9, %p589_p5  ;;  %s627_s30 = int_to_ptr.vmem [resolvable:$true] %s128_s30 }
  0x17   : > { %s118_s4 = scalar_lea.sflag [#allocation3], %s608_s23  ;;  %s402_s5 = scalar_lea.hbm %s617_s28, 256 }
  0x18   : > { %p403_p13 = scmp.ne.s32.totalorder %s617_s28, %s402_s5  ;;  %p404_p0 = pneg %p623_p12 }
  0x19   : > { %s407_s8 = scalar_lea.hbm %s767_s0, 1024  ;;  %p408_p3 = scmp.lt.s32.totalorder %s617_s28, %s767_s0 }
  0x1a   : > { %p405_p1 = pnand %p404_p0, %p403_p13  ;;  %p409_p4 = scmp.lt.s32.totalorder %s407_s8, %s402_s5 }
  0x1c   : > { %p406_p2 = pneg %p405_p1  ;;  %p410_p5 = por %p409_p4, %p408_p3 }
  0x1e   : > { %p411_p7 = pnand %p410_p5, %p406_p2 }
  0x20   : > { %414 = shalt.err (!%p411_p7)
}
  0x21   : > { %s415_s17 = scalar_lea.vmem %s627_s30, 256  ;;  %s528_s19 = smov [#allocation2]  }
  0x22   : > { %p416_p8 = scmp.ne.s32.totalorder %s627_s30, %s415_s17  ;;  %s420_s26 = sshll.u32 %s528_s19, 4  ;;  %s421_s26 = int_to_ptr.vmem [resolvable:$false] %s420_s26 }
  0x23   : > { %s422_s27 = scalar_lea.vmem %s421_s26, 512  ;;  %p423_p1 = scmp.lt.s32.totalorder %s627_s30, %s421_s26 }
  0x24   : > { %p418_p9 = pnand %p416_p8, %p404_p0  ;;  %p424_p11 = scmp.lt.s32.totalorder %s422_s27, %s415_s17 }
  0x26   : > { %p419_p13 = pneg %p418_p9  ;;  %p425_p10 = por %p424_p11, %p423_p1 }
  0x28   : > { %p426_p3 = pnand %p425_p10, %p419_p13 }
  0x2a   : > { %429 = shalt.err (!%p426_p3)
}
  0x2b   : > { %s529_s29 = smov 128   ;;  %s530_s5 = smov 8  }
  0x2c   : > { %356 = dma.hbm_to_vmem [thread:$0]  (!%p623_p12), %s617_s28, 256, %s627_s30, %s118_s4, %s529_s29, %s529_s29, %s530_s5  }
  0x2d   : > { %p335_p10 = scmp.ge.s32.totalorder %s526_s12, 1  ;;  %p157_p11 = scmp.lt.s32.totalorder %s526_s12, 5 }
  0x2e   : > { %s670_s14 = scalar_lea.hbm %s768_s1, %s343_s24  ;;  %s142_s16 = scalar_lea.vmem [#allocation5], %s329_s25 }
  0x2f   : > { %p661_p2 = pnand %p335_p10, %p157_p11  ;;  %s149_s17 = sshll.u32 %s142_s16, 4  ;;  %s674_s17 = int_to_ptr.vmem [resolvable:$true] %s149_s17 }
  0x30   : > { %s139_s28 = scalar_lea.sflag [#allocation6], %s608_s23  ;;  %s430_s30 = scalar_lea.hbm %s670_s14, 256 }
  0x31   : > { %p431_p4 = scmp.ne.s32.totalorder %s670_s14, %s430_s30  ;;  %s435_s24 = scalar_lea.hbm %s768_s1, 1024 }
  0x32   : > { %p436_p8 = scmp.lt.s32.totalorder %s670_s14, %s768_s1  ;;  %p437_p9 = scmp.lt.s32.totalorder %s435_s24, %s430_s30 }
  0x33   : > { %p433_p5 = pnand %p431_p4, %p404_p0 }
  0x34   : > { %p438_p13 = por %p437_p9, %p436_p8 }
  0x35   : > { %p434_p7 = pneg %p433_p5 }
  0x37   : > { %p439_p1 = pnand %p438_p13, %p434_p7 }
  0x39   : > { %442 = shalt.err (!%p439_p1)
}
  0x3a   : > { %s443_s23 = scalar_lea.vmem %s674_s17, 256  ;;  %s531_s25 = smov [#allocation5]  }
  0x3b   : > { %p444_p3 = scmp.ne.s32.totalorder %s674_s17, %s443_s23  ;;  %s448_s7 = sshll.u32 %s531_s25, 4  ;;  %s449_s7 = int_to_ptr.vmem [resolvable:$false] %s448_s7 }
  0x3c   : > { %s450_s8 = scalar_lea.vmem %s449_s7, 512  ;;  %p451_p4 = scmp.lt.s32.totalorder %s674_s17, %s449_s7 }
  0x3d   : > { %p446_p10 = pnand %p444_p3, %p404_p0  ;;  %p452_p5 = scmp.lt.s32.totalorder %s450_s8, %s443_s23 }
  0x3f   : > { %p447_p11 = pneg %p446_p10  ;;  %p453_p6 = por %p452_p5, %p451_p4 }
  0x41   : > { %p454_p8 = pnand %p453_p6, %p447_p11 }
  0x43   : > { %457 = shalt.err (!%p454_p8)
}
  0x44   : > { %359 = dma.hbm_to_vmem [thread:$0]  (!%p623_p12), %s670_s14, 256, %s674_s17, %s139_s28, %s529_s29, %s529_s29, %s530_s5  }
  0x45   : > { %161 = sbr.rel (%p661_p2) target bundleno = 103 (0x67), region = 28  ;;  %s705_s16 = sand.u32 (!%p661_p2), 1, %s518_s10  }
  0x46   : > { %s336_s30 = sshll.u32 (!%p661_p2), %s705_s16, 4  ;;  %s164_s4 = scalar_lea.sflag (!%p661_p2), [#allocation3], %s705_s16 }
  0x47   : > { %s167_s19 = scalar_lea.vmem (!%p661_p2), [#allocation2], %s336_s30  ;;  %p778_p6 = scmp.ne.s32.totalorder (!%p661_p2), %s773_s20, 0 }
  0x4a   : > { %501 = dma.done.wait (%p778_p6), %s164_s4, 256  }
  0x4b   : > { %503 = vsyncadd (%p778_p6), %s164_s4, 4294967040  ;;  %s173_s3 = scalar_lea.sflag [#allocation6], %s705_s16  ;;  %s176_s29 = scalar_lea.vmem [#allocation5], %s336_s30 }
  0x4c   : > { %505 = dma.done.wait (%p778_p6), %s173_s3, 256  }
  0x4d   : > { %507 = vsyncadd (%p778_p6), %s173_s3, 4294967040  ;;  %s345_s5 = smul.u32 48, %s705_s16  ;;  %v205_v0 = vld [vmem:[%s167_s19] sm:$0xff]  ;;  %v206_v1 = vld [vmem:[%s167_s19 + $0x8] sm:$0xff]  ;;  %p779_p0 = scmp.ne.s32.totalorder %s774_s21, 0 }
  0x4e   : > { %s346_s6 = smul.u32 768, %s571_s13  ;;  %v211_v2 = vld [vmem:[%s176_s29] sm:$0xff]  ;;  %v212_v3 = vld [vmem:[%s176_s29 + $0x8] sm:$0xff]  ;;  %s216_s13 = scalar_lea.sflag [#allocation4], %s705_s16 }
  0x4f   : > { %s201_s14 = scalar_lea.vmem [#allocation7], %s345_s5  ;;  %s532_s27 = smov [#allocation7]  }
  0x50   : > { %s230_s17 = sshll.u32 %s201_s14, 4  ;;  %s725_s20 = scalar_lea.hbm %s769_s2, %s346_s6  ;;  %207 = vst [vmem:[%s201_s14] sm:$0xff] %v205_v0  ;;  %209 = vst [vmem:[%s201_s14 + $0x10] sm:$0xff] %v205_v0  ;;  %s720_s17 = int_to_ptr.vmem [resolvable:$true] %s230_s17 }
  0x51   : > { %208 = vst [vmem:[%s201_s14 + $0x18] sm:$0xff] %v206_v1  ;;  %210 = vst [vmem:[%s201_s14 + $0x28] sm:$0xff] %v206_v1  ;;  %s458_s26 = scalar_lea.vmem %s720_s17, 768  ;;  %s462_s23 = sshll.u32 %s532_s27, 4  ;;  %s463_s23 = int_to_ptr.vmem [resolvable:$false] %s462_s23 }
  0x52   : > { %213 = vst [vmem:[%s201_s14 + $0x8] sm:$0xff] %v211_v2  ;;  %214 = vst [vmem:[%s201_s14 + $0x20] sm:$0xff] %v212_v3  ;;  %p459_p12 = scmp.ne.s32.totalorder %s720_s17, %s458_s26  ;;  %s464_s25 = scalar_lea.vmem %s463_s23, 1536 }
  0x53   : > { %p465_p9 = scmp.lt.s32.totalorder %s720_s17, %s463_s23  ;;  %p466_p13 = scmp.lt.s32.totalorder %s464_s25, %s458_s26 }
  0x54   : > { %p460_p2 = pnand %p459_p12, %p779_p0 }
  0x55   : > { %p467_p1 = por %p466_p13, %p465_p9 }
  0x56   : > { %p461_p7 = pneg %p460_p2 }
  0x58   : > { %p468_p3 = pnand %p467_p1, %p461_p7 }
  0x5a   : > { %471 = shalt.err (!%p468_p3)
}
  0x5b   : > { %s472_s7 = scalar_lea.hbm %s725_s20, 768  ;;  %s476_s4 = scalar_lea.hbm %s769_s2, 3072 }
  0x5c   : > { %p473_p10 = scmp.ne.s32.totalorder %s725_s20, %s472_s7  ;;  %p477_p5 = scmp.lt.s32.totalorder %s725_s20, %s769_s2 }
  0x5d   : > { %p478_p8 = scmp.lt.s32.totalorder %s476_s4, %s472_s7 }
  0x5e   : > { %p474_p11 = pnand %p473_p10, %p779_p0 }
  0x5f   : > { %p479_p6 = por %p478_p8, %p477_p5 }
  0x60   : > { %p475_p4 = pneg %p474_p11 }
  0x62   : > { %p480_p12 = pnand %p479_p6, %p475_p4 }
  0x64   : > { %483 = shalt.err (!%p480_p12)
}
  0x65   : > { %s533_s29 = smov 384   ;;  %s534_s5 = smov 24  }
  0x66   : > { %351 = dma.vmem_to_hbm [thread:$0]  (%p779_p0), %s720_s17, 768, %s725_s20, %s216_s13, %s533_s29, %s533_s29, %s534_s5  }
  0x67 PF: > { %p365_p2 = scmp.ge.s32.totalorder %s526_s12, 2  ;;  %s245_s6 = sand.u32 1, %s514_s9  }
  0x68   : > { %p780_p7 = scmp.ne.s32.totalorder %s775_s22, 0  ;;  %s246_s14 = scalar_lea.sflag [#allocation4], %s245_s6 }
  0x6a   : > { %p361_p9 = pnand %p365_p2, %p780_p7 }
  0x6c   : > { %p362_p13 = pneg %p361_p9 }
  0x6e   : > { %509 = dma.done.wait (%p362_p13), %s246_s14, 768  }
  0x6f   : > { %511 = vsyncadd (%p362_p13), %s246_s14, 4294966528  ;;  %p18_p1 = scmp.ge.s32.totalorder %s575_s15, 6   ;;  %s781_s9 = smov %s518_s10 }
  0x70   : > { %s782_s10 = smov %s522_s11  ;;  %s783_s11 = smov %s587_s18 }
  0x71   : > { %s784_s12 = smov %s575_s15  ;;  %20 = sbr.rel (!%p18_p1) target bundleno = 7 (0x7), region = 86 }
  0x76   :  { %251 = vsyncpa [#allocation3], 1 }
  0x77   :  { %253 = vsyncpa [#allocation3 + $0x1], 1 }
  0x78   :  { %254 = vsyncpa [#allocation6], 1 }
  0x79   :  { %256 = vsyncpa [#allocation6 + $0x1], 1 }
  0x7a   :  { %257 = vsyncpa [#allocation4], 1 }
  0x7b   :  { %259 = vsyncpa [#allocation4 + $0x1], 1 }

</bundles_post_ra>
